<compile_context>
chip_gen: v7x
topology: tpu7x:2x2x1
jax: 0.10.0
libtpu: 0.0.40
codegen_flags: <defaults>
</compile_context>

<pallas_src>
import math
from functools import partial

import jax
import jax.numpy as jnp
from jax import lax
from jax.experimental import pallas as pl
from jax.experimental.pallas import tpu as pltpu

GROUPS = 8
EPS = 1e-5
_NT = (((1,), (1,)), ((), ()))   # contract last dims of both operands (A @ B.T)


def _self_attention_kernel(x_ref, w_ref, b_ref, gnb_ref, grp_ref, o_ref,
                           *, N, TQ, C, n_q):
    """One (batch, q-tile) grid step.

    x_ref  : (N, C)   f32   all tokens of this batch element
    w_ref  : (C, 4C)  bf16  packed weights  [wq | wk | wv | wproj]
    b_ref  : (1, 4C)  f32   packed biases   [bq | bk | bv | bproj]
    gnb_ref: (2, C)   f32   [gamma; beta]
    grp_ref: (C, G)   f32   one-hot channel->group membership
    o_ref  : (TQ, C)        output tile: x + proj(attn(...))
    """
    gs = C // GROUPS
    x = x_ref[...]                                                        # (N, C) f32

    # ---- GroupNorm statistics (global over the image) ---------------------------
    # token-axis (sublane/XLU) reduction first, then tiny per-group one-hot dots.
    inv_count = 1.0 / (N * gs)
    grp = grp_ref[...]                                                    # (C, G)
    grp_t = grp.T                                                         # (G, C), tiny
    sum_c = jnp.sum(x, axis=0, keepdims=True)                             # (1, C)
    mean_g = jnp.dot(sum_c, grp, preferred_element_type=jnp.float32) * inv_count   # (1, G)
    mean_c = jnp.dot(mean_g, grp_t, preferred_element_type=jnp.float32)             # (1, C)
    d = x - mean_c
    ssq_c = jnp.sum(d * d, axis=0, keepdims=True)                         # (1, C)
    var_g = jnp.dot(ssq_c, grp, preferred_element_type=jnp.float32) * inv_count     # (1, G)
    inv_c = jnp.dot(lax.rsqrt(var_g + EPS), grp_t,
                    preferred_element_type=jnp.float32)                   # (1, C)

    gamma = gnb_ref[0:1, :]
    beta = gnb_ref[1:2, :]
    scale_c = inv_c * gamma                                               # fused GN scale

    if n_q == 1:
        # Whole image in one query tile: single fused qkv matmul (3C output lanes).
        xn_b = (d * scale_c + beta).astype(jnp.bfloat16)                  # (N, C)
        qkv = jnp.dot(xn_b, w_ref[:, :3 * C],
                      preferred_element_type=jnp.float32) + b_ref[:, :3 * C]   # (N, 3C)
        q = qkv[:, :C]
        k = qkv[:, C:2 * C]
        v = qkv[:, 2 * C:]
        x_q = x
    else:
        # Query-tiled path: K/V over the full image, Q only for this tile.
        xn_b = (d * scale_c + beta).astype(jnp.bfloat16)                  # (N, C)
        kv = jnp.dot(xn_b, w_ref[:, C:3 * C],
                     preferred_element_type=jnp.float32) + b_ref[:, C:3 * C]    # (N, 2C)
        k = kv[:, :C]
        v = kv[:, C:]
        start = pl.multiple_of(pl.program_id(1) * TQ, TQ)
        x_q = x_ref[pl.ds(start, TQ), :]                                  # (TQ, C)
        xnq_b = ((x_q - mean_c) * scale_c + beta).astype(jnp.bfloat16)
        q = jnp.dot(xnq_b, w_ref[:, :C],
                    preferred_element_type=jnp.float32) + b_ref[:, :C]    # (TQ, C)

    # ---- attention over spatial tokens (bf16 operands, f32 accumulation) --------
    s = lax.dot_general(q.astype(jnp.bfloat16), k.astype(jnp.bfloat16), _NT,
                        preferred_element_type=jnp.float32) * (1.0 / math.sqrt(C))  # (TQ, N)
    s_max = jnp.max(s, axis=-1, keepdims=True)
    p = jnp.exp(s - s_max)                                                # unnormalized probs
    inv_l = pl.reciprocal(jnp.sum(p, axis=-1, keepdims=True), approx=True)  # EUP, (TQ, 1)
    out = jnp.dot(p.astype(jnp.bfloat16), v.astype(jnp.bfloat16),
                  preferred_element_type=jnp.float32) * inv_l             # (TQ, C)

    # ---- 1x1 projection + residual ----------------------------------------------
    proj = jnp.dot(out.astype(jnp.bfloat16), w_ref[:, 3 * C:],
                   preferred_element_type=jnp.float32) + b_ref[:, 3 * C:]  # (TQ, C)
    o_ref[...] = (x_q + proj).astype(o_ref.dtype)


def self_attention(x_nchw, params, *, q_tile=256):
    """x_nchw: (B, C, H, W) float32. params = (w_all, b_all, gnb, grp) from init_params."""
    B, C, H, W = x_nchw.shape
    assert C % GROUPS == 0, "channels must be divisible by 8 (GroupNorm groups)"
    N = H * W
    x = jnp.transpose(x_nchw.reshape(B, C, N), (0, 2, 1))                 # (B, N, C)

    w_all, b_all, gnb, grp = params

    # query tile: whole image if it is small, else an 8-aligned divisor of N
    if N <= q_tile:
        TQ = N
    else:
        TQ = q_tile
        while TQ > 8 and N % TQ != 0:
            TQ //= 2
        if N % TQ != 0 or TQ % 8 != 0:
            TQ = N                                                        # fallback: untiled
    n_q = N // TQ

    kernel = partial(_self_attention_kernel, N=N, TQ=TQ, C=C, n_q=n_q)

    # VMEM budget: x block + out tile (double buffered) + packed params + live
    # activations (xn, kv/qkv, (TQ,N) scores + probs, q/out/proj), with 2x headroom.
    est = (2 * N * C * 4 + 2 * TQ * C * 4
           + 2 * (4 * C * C * 2 + 4 * C * 4 + 2 * C * 4 + C * GROUPS * 4)
           + 3 * N * C * 4 + 2 * TQ * N * 4 + 6 * TQ * C * 4)
    vmem_limit = int(max(16 * 1024 * 1024, min(48 * 1024 * 1024, 2 * est)))

    out = pl.pallas_call(
        kernel,
        out_shape=jax.ShapeDtypeStruct((B, N, C), x_nchw.dtype),
        grid_spec=pltpu.PrefetchScalarGridSpec(
            num_scalar_prefetch=0,
            grid=(B, n_q),
            in_specs=[
                pl.BlockSpec((None, N, C), lambda b, q: (b, 0, 0)),       # x (full image)
                pl.BlockSpec((C, 4 * C), lambda b, q: (0, 0)),            # packed weights (bf16)
                pl.BlockSpec((1, 4 * C), lambda b, q: (0, 0)),            # packed biases
                pl.BlockSpec((2, C), lambda b, q: (0, 0)),                # gamma / beta
                pl.BlockSpec((C, GROUPS), lambda b, q: (0, 0)),           # group one-hot
            ],
            out_specs=pl.BlockSpec((None, TQ, C), lambda b, q: (b, q, 0)),
        ),
        compiler_params=pltpu.CompilerParams(
            dimension_semantics=("parallel", "parallel"),
            vmem_limit_bytes=vmem_limit),
    )(x, w_all, b_all, gnb, grp)

    return jnp.transpose(out, (0, 2, 1)).reshape(B, C, H, W)


def init_params(key, C):
    """Deterministic synthetic parameters matching the PyTorch module's shapes, packed."""
    k1, k2, k3, k4 = jax.random.split(key, 4)
    bound = 1.0 / math.sqrt(C)
    w_qkv = jax.random.uniform(k1, (3 * C, C), jnp.float32, -bound, bound)   # conv (out, in)
    b_qkv = jax.random.uniform(k2, (3 * C,), jnp.float32, -bound, bound)
    w_proj = jax.random.uniform(k3, (C, C), jnp.float32, -bound, bound)
    b_proj = jax.random.uniform(k4, (C,), jnp.float32, -bound, bound)
    gamma = jnp.ones((C,), jnp.float32)                                      # nn.GroupNorm defaults
    beta = jnp.zeros((C,), jnp.float32)

    # packed matmul layout: columns [0:3C] = qkv (q|k|v), [3C:4C] = proj
    w_all = jnp.concatenate([w_qkv.T, w_proj.T], axis=1).astype(jnp.bfloat16)   # (C, 4C) bf16
    b_all = jnp.concatenate([b_qkv, b_proj]).reshape(1, 4 * C)                  # (1, 4C) f32
    gnb = jnp.stack([gamma, beta], axis=0)                                      # (2, C)
    grp = (jnp.arange(C)[:, None] // (C // GROUPS)
           == jnp.arange(GROUPS)[None, :]).astype(jnp.float32)                  # (C, G)
    return (w_all, b_all, gnb, grp)


def reference(x_nchw, params):
    """Pure-JAX f32 reference mirroring the PyTorch forward exactly (for validation)."""
    w_all, b_all, gnb, grp = params
    B, C, H, W = x_nchw.shape
    N = H * W
    w = w_all.astype(jnp.float32)
    wq, wk, wv, wp = w[:, :C], w[:, C:2 * C], w[:, 2 * C:3 * C], w[:, 3 * C:]
    bq, bk, bv, bp = (b_all[:, :C], b_all[:, C:2 * C],
                      b_all[:, 2 * C:3 * C], b_all[:, 3 * C:])
    gamma, beta = gnb[0], gnb[1]

    xg = x_nchw.reshape(B, GROUPS, C // GROUPS, H, W)
    mu = jnp.mean(xg, axis=(2, 3, 4), keepdims=True)
    var = jnp.mean((xg - mu) ** 2, axis=(2, 3, 4), keepdims=True)
    xn = ((xg - mu) * jax.lax.rsqrt(var + EPS)).reshape(B, C, H, W)
    xn = xn * gamma.reshape(1, C, 1, 1) + beta.reshape(1, C, 1, 1)
    t = jnp.transpose(xn.reshape(B, C, N), (0, 2, 1))                     # (B, N, C)
    q = t @ wq + bq
    k = t @ wk + bk
    v = t @ wv + bv
    attn = jax.nn.softmax(jnp.einsum("bnc,bmc->bnm", q, k) / math.sqrt(C), axis=-1)
    out = jnp.einsum("bnm,bmc->bnc", attn, v)
    proj = out @ wp + bp
    proj = jnp.transpose(proj, (0, 2, 1)).reshape(B, C, H, W)
    return x_nchw + proj


if __name__ == "__main__":
    key = jax.random.PRNGKey(0)
    kx1, kx2, kp = jax.random.split(key, 3)

    B, C = 2, 32
    params = init_params(kp, C)

    # Case 1: 8x8 image -> single query tile (fully fused qkv path).
    x1 = jax.random.normal(kx1, (B, C, 8, 8), jnp.float32)
    y1 = jax.block_until_ready(self_attention(x1, params))
    r1 = reference(x1, params)
    assert y1.shape == x1.shape
    # bf16 matmul operands + approx reciprocal -> loosened (but still tight) tolerance
    assert jnp.allclose(y1, r1, rtol=2e-2, atol=2e-2), float(jnp.max(jnp.abs(y1 - r1)))

    # Case 2: 16x16 image with q_tile=128 -> exercises the query-tiled (2-block) path.
    x2 = jax.random.normal(kx2, (B, C, 16, 16), jnp.float32)
    y2 = jax.block_until_ready(self_attention(x2, params, q_tile=128))
    r2 = reference(x2, params)
    assert y2.shape == x2.shape
    assert jnp.allclose(y2, r2, rtol=2e-2, atol=2e-2), float(jnp.max(jnp.abs(y2 - r2)))

    print("KERNEL_OK")
</pallas_src>

<mosaic_0001>
module attributes {stable_mosaic.version = 11 : i64} {
  func.func @_self_attention_kernel(%arg0: i32, %arg1: i32, %arg2: memref<1x64x32xf32, #tpu.memory_space<vmem>>, %arg3: memref<32x128xbf16, #tpu.memory_space<vmem>>, %arg4: memref<1x128xf32, #tpu.memory_space<vmem>>, %arg5: memref<2x32xf32, #tpu.memory_space<vmem>>, %arg6: memref<32x8xf32, #tpu.memory_space<vmem>>, %arg7: memref<1x64x32xf32, #tpu.memory_space<vmem>>) attributes {dimension_semantics = [#tpu.dimension_semantics<parallel>, #tpu.dimension_semantics<parallel>], iteration_bounds = array<i64: 2, 1>, scalar_prefetch = 0 : i64, scratch_operands = 0 : i64, tpu.core_type = #tpu.core_type<tc>, window_params = [{transform_indices = @transform_0, window_bounds = array<i64: 1, 64, 32>}, {pipeline_mode = #tpu.pipeline_mode<synchronous>, transform_indices = @transform_1, window_bounds = array<i64: 32, 128>}, {pipeline_mode = #tpu.pipeline_mode<synchronous>, transform_indices = @transform_2, window_bounds = array<i64: 1, 128>}, {pipeline_mode = #tpu.pipeline_mode<synchronous>, transform_indices = @transform_3, window_bounds = array<i64: 2, 32>}, {pipeline_mode = #tpu.pipeline_mode<synchronous>, transform_indices = @transform_4, window_bounds = array<i64: 32, 8>}, {transform_indices = @transform_5, window_bounds = array<i64: 1, 64, 32>}]} {
    %c0 = arith.constant 0 : index
    %c0_0 = arith.constant 0 : index
    %c0_1 = arith.constant 0 : index
    %0 = vector.load %arg2[%c0, %c0_0, %c0_1] : memref<1x64x32xf32, #tpu.memory_space<vmem>>, vector<1x64x32xf32>
    %1 = vector.shape_cast %0 : vector<1x64x32xf32> to vector<64x32xf32>
    %c0_2 = arith.constant 0 : index
    %c0_3 = arith.constant 0 : index
    %2 = vector.load %arg6[%c0_2, %c0_3] : memref<32x8xf32, #tpu.memory_space<vmem>>, vector<32x8xf32>
    %3 = tpu.transpose %2, [1, 0] : vector<32x8xf32> -> vector<8x32xf32>
    %cst = arith.constant dense<0.000000e+00> : vector<32xf32>
    %4 = vector.multi_reduction <add>, %1, %cst [0] : vector<64x32xf32> to vector<32xf32>
    %5 = vector.shape_cast %4 : vector<32xf32> to vector<1x32xf32>
    %cst_4 = arith.constant dense<0.000000e+00> : vector<1x8xf32>
    %6 = tpu.matmul %5, %2, %cst_4 {dimension_numbers = #tpu.dot_dimension_numbers<[1], [0], [0], [1], [0, 0, 1, 1], [], []>} : vector<1x32xf32>, vector<32x8xf32>, vector<1x8xf32> -> vector<1x8xf32>
    %cst_5 = arith.constant 3.906250e-03 : f32
    %7 = vector.broadcast %cst_5 : f32 to vector<1x8xf32>
    %8 = arith.mulf %6, %7 : vector<1x8xf32>
    %cst_6 = arith.constant dense<0.000000e+00> : vector<1x32xf32>
    %9 = tpu.matmul %8, %3, %cst_6 {dimension_numbers = #tpu.dot_dimension_numbers<[1], [0], [0], [1], [0, 0, 1, 1], [], []>} : vector<1x8xf32>, vector<8x32xf32>, vector<1x32xf32> -> vector<1x32xf32>
    %10 = vector.broadcast %9 : vector<1x32xf32> to vector<64x32xf32>
    %11 = arith.subf %1, %10 : vector<64x32xf32>
    %12 = arith.mulf %11, %11 : vector<64x32xf32>
    %cst_7 = arith.constant dense<0.000000e+00> : vector<32xf32>
    %13 = vector.multi_reduction <add>, %12, %cst_7 [0] : vector<64x32xf32> to vector<32xf32>
    %14 = vector.shape_cast %13 : vector<32xf32> to vector<1x32xf32>
    %cst_8 = arith.constant dense<0.000000e+00> : vector<1x8xf32>
    %15 = tpu.matmul %14, %2, %cst_8 {dimension_numbers = #tpu.dot_dimension_numbers<[1], [0], [0], [1], [0, 0, 1, 1], [], []>} : vector<1x32xf32>, vector<32x8xf32>, vector<1x8xf32> -> vector<1x8xf32>
    %cst_9 = arith.constant 3.906250e-03 : f32
    %16 = vector.broadcast %cst_9 : f32 to vector<1x8xf32>
    %17 = arith.mulf %15, %16 : vector<1x8xf32>
    %cst_10 = arith.constant 9.99999974E-6 : f32
    %18 = vector.broadcast %cst_10 : f32 to vector<1x8xf32>
    %19 = arith.addf %17, %18 : vector<1x8xf32>
    %20 = math.rsqrt %19 : vector<1x8xf32>
    %cst_11 = arith.constant dense<0.000000e+00> : vector<1x32xf32>
    %21 = tpu.matmul %20, %3, %cst_11 {dimension_numbers = #tpu.dot_dimension_numbers<[1], [0], [0], [1], [0, 0, 1, 1], [], []>} : vector<1x8xf32>, vector<8x32xf32>, vector<1x32xf32> -> vector<1x32xf32>
    %c0_12 = arith.constant 0 : index
    %c0_13 = arith.constant 0 : index
    %22 = vector.load %arg5[%c0_12, %c0_13] : memref<2x32xf32, #tpu.memory_space<vmem>>, vector<1x32xf32>
    %c1 = arith.constant 1 : index
    %c0_14 = arith.constant 0 : index
    %23 = vector.load %arg5[%c1, %c0_14] : memref<2x32xf32, #tpu.memory_space<vmem>>, vector<1x32xf32>
    %24 = arith.mulf %21, %22 : vector<1x32xf32>
    %25 = vector.broadcast %24 : vector<1x32xf32> to vector<64x32xf32>
    %26 = arith.mulf %11, %25 : vector<64x32xf32>
    %27 = vector.broadcast %23 : vector<1x32xf32> to vector<64x32xf32>
    %28 = arith.addf %26, %27 : vector<64x32xf32>
    %29 = arith.truncf %28 : vector<64x32xf32> to vector<64x32xbf16>
    %c0_15 = arith.constant 0 : index
    %c0_16 = arith.constant 0 : index
    %30 = vector.load %arg3[%c0_15, %c0_16] : memref<32x128xbf16, #tpu.memory_space<vmem>>, vector<32x96xbf16>
    %cst_17 = arith.constant dense<0.000000e+00> : vector<64x96xf32>
    %31 = tpu.matmul %29, %30, %cst_17 {dimension_numbers = #tpu.dot_dimension_numbers<[1], [0], [0], [1], [0, 0, 1, 1], [], []>} : vector<64x32xbf16>, vector<32x96xbf16>, vector<64x96xf32> -> vector<64x96xf32>
    %c0_18 = arith.constant 0 : index
    %c0_19 = arith.constant 0 : index
    %32 = vector.load %arg4[%c0_18, %c0_19] : memref<1x128xf32, #tpu.memory_space<vmem>>, vector<1x96xf32>
    %33 = vector.broadcast %32 : vector<1x96xf32> to vector<64x96xf32>
    %34 = arith.addf %31, %33 : vector<64x96xf32>
    %35 = vector.extract_strided_slice %34 {offsets = [0, 0], sizes = [64, 32], strides = [1, 1]} : vector<64x96xf32> to vector<64x32xf32>
    %36 = vector.extract_strided_slice %34 {offsets = [0, 32], sizes = [64, 32], strides = [1, 1]} : vector<64x96xf32> to vector<64x32xf32>
    %37 = vector.extract_strided_slice %34 {offsets = [0, 64], sizes = [64, 32], strides = [1, 1]} : vector<64x96xf32> to vector<64x32xf32>
    %38 = arith.truncf %35 : vector<64x32xf32> to vector<64x32xbf16>
    %39 = arith.truncf %36 : vector<64x32xf32> to vector<64x32xbf16>
    %cst_20 = arith.constant dense<0.000000e+00> : vector<64x64xf32>
    %40 = tpu.matmul %38, %39, %cst_20 {dimension_numbers = #tpu.dot_dimension_numbers<[1], [1], [0], [0], [0, 0, 1, 0], [], []>} : vector<64x32xbf16>, vector<64x32xbf16>, vector<64x64xf32> -> vector<64x64xf32>
    %cst_21 = arith.constant 0.176776692 : f32
    %41 = vector.broadcast %cst_21 : f32 to vector<64x64xf32>
    %42 = arith.mulf %40, %41 : vector<64x64xf32>
    %cst_22 = arith.constant dense<0xFF800000> : vector<64xf32>
    %43 = vector.multi_reduction <maximumf>, %42, %cst_22 [1] : vector<64x64xf32> to vector<64xf32>
    %44 = vector.shape_cast %43 : vector<64xf32> to vector<64x1xf32>
    %45 = vector.broadcast %44 : vector<64x1xf32> to vector<64x64xf32>
    %46 = arith.subf %42, %45 : vector<64x64xf32>
    %47 = math.exp %46 : vector<64x64xf32>
    %cst_23 = arith.constant dense<0.000000e+00> : vector<64xf32>
    %48 = vector.multi_reduction <add>, %47, %cst_23 [1] : vector<64x64xf32> to vector<64xf32>
    %49 = vector.shape_cast %48 : vector<64xf32> to vector<64x1xf32>
    %50 = tpu.reciprocal %49 {approx = true} : vector<64x1xf32> -> vector<64x1xf32>
    %51 = arith.truncf %47 : vector<64x64xf32> to vector<64x64xbf16>
    %52 = arith.truncf %37 : vector<64x32xf32> to vector<64x32xbf16>
    %cst_24 = arith.constant dense<0.000000e+00> : vector<64x32xf32>
    %53 = tpu.matmul %51, %52, %cst_24 {dimension_numbers = #tpu.dot_dimension_numbers<[1], [0], [0], [1], [0, 0, 1, 1], [], []>} : vector<64x64xbf16>, vector<64x32xbf16>, vector<64x32xf32> -> vector<64x32xf32>
    %54 = vector.broadcast %50 : vector<64x1xf32> to vector<64x32xf32>
    %55 = arith.mulf %53, %54 : vector<64x32xf32>
    %56 = arith.truncf %55 : vector<64x32xf32> to vector<64x32xbf16>
    %c0_25 = arith.constant 0 : index
    %c96 = arith.constant 96 : index
    %57 = vector.load %arg3[%c0_25, %c96] : memref<32x128xbf16, #tpu.memory_space<vmem>>, vector<32x32xbf16>
    %cst_26 = arith.constant dense<0.000000e+00> : vector<64x32xf32>
    %58 = tpu.matmul %56, %57, %cst_26 {dimension_numbers = #tpu.dot_dimension_numbers<[1], [0], [0], [1], [0, 0, 1, 1], [], []>} : vector<64x32xbf16>, vector<32x32xbf16>, vector<64x32xf32> -> vector<64x32xf32>
    %c0_27 = arith.constant 0 : index
    %c96_28 = arith.constant 96 : index
    %59 = vector.load %arg4[%c0_27, %c96_28] : memref<1x128xf32, #tpu.memory_space<vmem>>, vector<1x32xf32>
    %60 = vector.broadcast %59 : vector<1x32xf32> to vector<64x32xf32>
    %61 = arith.addf %58, %60 : vector<64x32xf32>
    %62 = arith.addf %1, %61 : vector<64x32xf32>
    %c0_29 = arith.constant 0 : index
    %c0_30 = arith.constant 0 : index
    %c0_31 = arith.constant 0 : index
    %63 = vector.load %arg7[%c0_29, %c0_30, %c0_31] : memref<1x64x32xf32, #tpu.memory_space<vmem>>, vector<1x64x32xf32>
    %64 = vector.shape_cast %63 : vector<1x64x32xf32> to vector<64x32xf32>
    %65 = vector.shape_cast %62 : vector<64x32xf32> to vector<1x64x32xf32>
    tpu.vector_store %arg7[%c0_29, %c0_30, %c0_31], %65 {strides = array<i32>} : memref<1x64x32xf32, #tpu.memory_space<vmem>>, vector<1x64x32xf32>,
    return
  }
  func.func @transform_0(%arg0: i32, %arg1: i32) -> (i32, i32, i32) {
    %c0_i32 = arith.constant 0 : i32
    %c0_i32_0 = arith.constant 0 : i32
    %c0_i32_1 = arith.constant 0 : i32
    return %arg0, %c0_i32, %c0_i32_0 : i32, i32, i32
  }
  func.func @transform_1(%arg0: i32, %arg1: i32) -> (i32, i32) {
    %c0_i32 = arith.constant 0 : i32
    %c0_i32_0 = arith.constant 0 : i32
    %c0_i32_1 = arith.constant 0 : i32
    return %c0_i32, %c0_i32_0 : i32, i32
  }
  func.func @transform_2(%arg0: i32, %arg1: i32) -> (i32, i32) {
    %c0_i32 = arith.constant 0 : i32
    %c0_i32_0 = arith.constant 0 : i32
    %c0_i32_1 = arith.constant 0 : i32
    return %c0_i32, %c0_i32_0 : i32, i32
  }
  func.func @transform_3(%arg0: i32, %arg1: i32) -> (i32, i32) {
    %c0_i32 = arith.constant 0 : i32
    %c0_i32_0 = arith.constant 0 : i32
    %c0_i32_1 = arith.constant 0 : i32
    return %c0_i32, %c0_i32_0 : i32, i32
  }
  func.func @transform_4(%arg0: i32, %arg1: i32) -> (i32, i32) {
    %c0_i32 = arith.constant 0 : i32
    %c0_i32_0 = arith.constant 0 : i32
    %c0_i32_1 = arith.constant 0 : i32
    return %c0_i32, %c0_i32_0 : i32, i32
  }
  func.func @transform_5(%arg0: i32, %arg1: i32) -> (i32, i32, i32) {
    %c0_i32 = arith.constant 0 : i32
    %c0_i32_0 = arith.constant 0 : i32
    return %arg0, %arg1, %c0_i32 : i32, i32, i32
  }
}

</mosaic_0001>

<bundles_post_ra>
// kernel: tpu_custom_call.1
= control target key start
LH: loop header
LB: loop body
LE: loop exit
PB: predicated region body
PF: predicated region fallthrough
CT: control target
= control target key end

     0   :  { %s1597_s18 = smov 0   ;;  %s1599_s19 = smov 0   ;;  %s1851_s0 = inlined_call_operand.vmem [shape: f32[2,64,32], index: 0, kind: input, shape index: {}]   ;;  %s1852_s1 = inlined_call_operand.vmem [shape: bf16[32,128], index: 1, kind: input, shape index: {}]   ;;  %s1853_s2 = inlined_call_operand.vmem [shape: f32[1,128], index: 2, kind: input, shape index: {}]   ;;  %s1854_s3 = inlined_call_operand.vmem [shape: f32[2,32], index: 3, kind: input, shape index: {}]   ;;  %s1855_s4 = inlined_call_operand.vmem [shape: f32[32,8], index: 4, kind: input, shape index: {}]   ;;  %s1856_s5 = inlined_call_operand.vmem [shape: f32[2,64,32], index: 5, kind: output, shape index: {}]  }
   0x1   :  { %s1601_s20 = smov 0  }
   0x2 LB: > { %s27_s21 = sadd.s32 1, %s1555_s19  ;;  %p1250_p0 = scmp.ge.s32.totalorder %s1559_s20, 1  ;;  %s1559_s20 = sphi %s1601_s20, %s15_s20   ;;  %s1555_s19 = sphi %s1599_s19, %s1860_s19   ;;  %s1551_s18 = sphi %s1597_s18, %s1859_s18  }
   0x3   : > { %p29_p1 = scmp.ge.s32.totalorder %s27_s21, 2  ;;  %p201_p2 = scmp.lt.s32.totalorder %s1559_s20, 3 }
   0x5   : > { %s1862_s21 = smov (%p29_p1, %s27_s21), 0  ;;  %p202_p3 = pnand %p1250_p0, %p201_p2 }
   0x6   : > { %v257_v0 = vld [vmem:[%s1855_s4] sm:$0xff] (!%p202_p3)  ;;  %v258_v1 = vld [vmem:[%s1855_s4 + $0x8] sm:$0xff] (!%p202_p3)  ;;  %v259_v2 = vld [vmem:[%s1855_s4 + $0x10] sm:$0xff] (!%p202_p3)  ;;  %v1561_v3 = vmov (!%p202_p3), 0.0|0.0   ;;  %vm1562_vm0 = vmmov (!%p202_p3), 0   ;;  %v1563_v6 = vmov (!%p202_p3), 0.0   ;;  %v443_v41 = vlaneseq (!%p202_p3) }
   0x7   : > { %205 = sbr.rel (%p202_p3) target bundleno = 2158 (0x86e), region = 40  ;;  %1439 = vmatprep.subr.bf16.mxu0 (!%p202_p3), %v1561_v3  ;;  %v1625_v4 = vpack.c.bf16 (!%p202_p3), %v258_v1, %v257_v0  ;;  %v260_v5 = vld [vmem:[%s1855_s4 + $0x18] sm:$0xff] (!%p202_p3)  ;;  %1347 = vmatprep.mubr.msk.f32.mxu0 (!%p202_p3), %vm1562_vm0, %v1563_v6  ;;  %p233_p4 = scmp.lt.s32.totalorder (!%p202_p3), %s1551_s18, 1  ;;  %vm357_vm1 = vcmask (!%p202_p3), 64512   ;;  %vm261_vm3 = vcmask (!%p202_p3), 261120   ;;  %vm877_vm4 = vcmask (!%p202_p3), 523264  }
   0x8   : > { %1445 = vmatprep.subr.bf16.mxu1 (!%p202_p3), %v1561_v3  ;;  %vm1635_vm2 = vmpackc.low (!%p202_p3), %vm357_vm1, %vm357_vm1  ;;  %1358 = vmatprep.mubr.msk.f32.mxu1 (!%p202_p3), %vm1562_vm0, %v1563_v6  ;;  %v1642_v8 = vpack.c.bf16 (!%p202_p3), %v260_v5, %v259_v2  ;;  %v1702_v42 = vshrl.u32 (!%p202_p3), %v443_v41, 7  ;;  %s1564_s23 = smov (!%p202_p3), 96   ;;  %s1565_s24 = smov (!%p202_p3), 64  }
   0x9   : > { %1441 = vmatpush3.bf16.msra.mxu0 (!%p202_p3), %v1625_v4  ;;  %1448 = vmatpush3.bf16.xpose.msk.msra.mxu1 (!%p202_p3), %vm1635_vm2, %v1625_v4  ;;  %s1566_s25 = smov (!%p202_p3), 32  }
   0xa   : > { %1442 = vmatprep.subr.bf16.mxu0 (!%p202_p3), %v1561_v3  ;;  %1449 = vmatprep.subr.bf16.mxu1 (!%p202_p3), %v1561_v3  ;;  %v445_v43 = vsub.s32 (!%p202_p3), 0, %v1702_v42 }
   0xd   : > { %1444 = vmatpush3.bf16.msra.mxu0 (!%p202_p3), %v1642_v8 }
   0xe   : > { %s1864_s18 = smov (!%p233_p4, %s1551_s18), 1  ;;  %1453 = vmatprep.subr.bf16.mxu0 %v1561_v3 }
   0xf   : > { %s1289_s30 = sshll.u32 %s1864_s18, 6 }
  0x10   : > { %s237_s8 = scalar_lea.vmem %s1851_s0, %s1289_s30  ;;  %s246_s28 = scalar_lea.vmem %s1856_s5, %s1289_s30 }
  0x11   : > { %v1658_v9 = vld [vmem:[%s237_s8] sm:$0xff]  ;;  %v1660_v10 = vld [vmem:[%s237_s8 + $0x8] sm:$0xff]  ;;  %v1662_v11 = vld [vmem:[%s237_s8 + $0x10] sm:$0xff]  ;;  %1452 = vmatpush3.bf16.xpose.msk.msra.mxu1 %vm1635_vm2, %v1642_v8 }
  0x12   : > { %v1664_v12 = vld [vmem:[%s237_s8 + $0x18] sm:$0xff]  ;;  %v262_v13 = vsel %vm261_vm3, %v1658_v9, 0.0  ;;  %v263_v14 = vsel %vm261_vm3, %v1660_v10, 0.0  ;;  %v265_v15 = vsel %vm261_vm3, %v1662_v11, 0.0  ;;  %v1673_v16 = vld [vmem:[%s237_s8 + $0x20] sm:$0xff]  ;;  %v1677_v19 = vld [vmem:[%s237_s8 + $0x28] sm:$0xff] }
  0x13   : > { %v264_v17 = vadd.f32 %v263_v14, %v262_v13  ;;  %v267_v18 = vsel %vm261_vm3, %v1664_v12, 0.0  ;;  %v269_v21 = vsel %vm261_vm3, %v1673_v16, 0.0  ;;  %v1684_v22 = vld [vmem:[%s237_s8 + $0x30] sm:$0xff]  ;;  %v271_v24 = vsel %vm261_vm3, %v1677_v19, 0.0  ;;  %v1688_v25 = vld [vmem:[%s237_s8 + $0x38] sm:$0xff] }
  0x14   : > { %v273_v27 = vsel %vm261_vm3, %v1684_v22, 0.0  ;;  %v275_v29 = vsel %vm261_vm3, %v1688_v25, 0.0 }
  0x15   : > { %v266_v20 = vadd.f32 %v265_v15, %v264_v17 }
  0x17   : > { %v268_v23 = vadd.f32 %v267_v18, %v266_v20 }
  0x19   : > { %v270_v26 = vadd.f32 %v269_v21, %v268_v23 }
  0x1b   : > { %v272_v28 = vadd.f32 %v271_v24, %v270_v26 }
  0x1d   : > { %v274_v30 = vadd.f32 %v273_v27, %v272_v28 }
  0x1f   : > { %v276_v31 = vadd.f32 %v275_v29, %v274_v30 }
  0x21   : > { %v277_v32 = vrot.slane %v276_v31, 4 }
  0x23   : > { %v278_v33 = vadd.f32 %v277_v32, %v276_v31 }
  0x25   : > { %v279_v34 = vrot.slane %v278_v33, 2 }
  0x27   : > { %v280_v35 = vadd.f32 %v279_v34, %v278_v33 }
  0x29   : > { %v281_v36 = vrot.slane %v280_v35, 1 }
  0x2b   : > { %v282_v37 = vadd.f32 %v281_v36, %v280_v35 }
  0x2d   : > { %1348 = vmatmul.mubr.msk.f32.vlgmr.msra.gmra.mrb[0].mxu0 %vm261_vm3, %v282_v37 }
  0x2e   : > { %1455 = vmatpush3.bf16.msra.mxu0 %v1625_v4  ;;  %1369 = vmatprep.mubr.msk.f32.mxu0 %vm1562_vm0, %v1563_v6 }
  0x2f   : > { %1456 = vmatprep.subr.bf16.mxu0 %v1561_v3 }
  0x32   : > { %1458 = vmatpush3.bf16.msra.mxu0 %v1642_v8 }
  0x33   : > { %1459 = vmatprep.subr.bf16.mxu0 %v1561_v3 }
 0x100   : > { %v352_v38 = vpop.f32.mrb[0].mxu0 }
 0x101   : > { %v356_v39 = vmul.f32 0.00390625, %v352_v38  ;;  %v1349_v40 = vpop.f32.mrb[1].mxu0 }
 0x102   : > { %v1267_v40 = vld [vmem:[%s1854_s3 + $0x1] ss:$0 sm:$0xff] }
 0x103   : > { %1359 = vmatmul.mubr.msk.f32.vlgmr.msra.gmra.mrb[0].mxu1 %vm357_vm1, %v356_v39 }
 0x1d6   : > { %v439_v44 = vpop.f32.mrb[0].mxu1 }
 0x1d7   : > { %v446_v45 = vrot.slane %v439_v44, %v445_v43  ;;  %v1360_v46 = vpop.f32.mrb[1].mxu1 }
 0x1d9   : > { %v447_v47 = vsub.f32 %v1658_v9, %v446_v45  ;;  %v448_v48 = vsub.f32 %v1660_v10, %v446_v45  ;;  %v449_v49 = vsub.f32 %v1662_v11, %v446_v45  ;;  %v450_v50 = vsub.f32 %v1664_v12, %v446_v45 }
 0x1da   : > { %v451_v51 = vsub.f32 %v1673_v16, %v446_v45  ;;  %v452_v55 = vsub.f32 %v1677_v19, %v446_v45  ;;  %v453_v60 = vsub.f32 %v1684_v22, %v446_v45  ;;  %v454_v0 = vsub.f32 %v1688_v25, %v446_v45 }
 0x1db   : > { %v455_v52 = vmul.f32 %v447_v47, %v447_v47  ;;  %v456_v53 = vmul.f32 %v448_v48, %v448_v48  ;;  %v457_v54 = vmul.f32 %v449_v49, %v449_v49  ;;  %v458_v56 = vmul.f32 %v450_v50, %v450_v50 }
 0x1dc   : > { %v459_v61 = vmul.f32 %v451_v51, %v451_v51  ;;  %v460_v1 = vmul.f32 %v452_v55, %v452_v55  ;;  %v461_v13 = vmul.f32 %v453_v60, %v453_v60  ;;  %v462_v17 = vmul.f32 %v454_v0, %v454_v0 }
 0x1dd   : > { %v463_v57 = vsel %vm261_vm3, %v455_v52, 0.0  ;;  %v464_v58 = vsel %vm261_vm3, %v456_v53, 0.0  ;;  %v466_v62 = vsel %vm261_vm3, %v457_v54, 0.0  ;;  %v468_v2 = vsel %vm261_vm3, %v458_v56, 0.0 }
 0x1de   : > { %v465_v59 = vadd.f32 %v464_v58, %v463_v57  ;;  %v470_v14 = vsel %vm261_vm3, %v459_v61, 0.0  ;;  %v472_v18 = vsel %vm261_vm3, %v460_v1, 0.0  ;;  %v474_v21 = vsel %vm261_vm3, %v461_v13, 0.0 }
 0x1df   : > { %v476_v24 = vsel %vm261_vm3, %v462_v17, 0.0 }
 0x1e0   : > { %v467_v63 = vadd.f32 %v466_v62, %v465_v59 }
 0x1e2   : > { %v469_v5 = vadd.f32 %v468_v2, %v467_v63 }
 0x1e4   : > { %v471_v15 = vadd.f32 %v470_v14, %v469_v5 }
 0x1e6   : > { %v473_v20 = vadd.f32 %v472_v18, %v471_v15 }
 0x1e8   : > { %v475_v23 = vadd.f32 %v474_v21, %v473_v20 }
 0x1ea   : > { %v477_v26 = vadd.f32 %v476_v24, %v475_v23 }
 0x1ec   : > { %v478_v27 = vrot.slane %v477_v26, 4 }
 0x1ee   : > { %v479_v28 = vadd.f32 %v478_v27, %v477_v26 }
 0x1f0   : > { %v480_v29 = vrot.slane %v479_v28, 2 }
 0x1f2   : > { %v481_v30 = vadd.f32 %v480_v29, %v479_v28 }
 0x1f4   : > { %v482_v31 = vrot.slane %v481_v30, 1 }
 0x1f6   : > { %v483_v32 = vadd.f32 %v482_v31, %v481_v30 }
 0x1f8   : > { %1370 = vmatmul.mubr.msk.f32.vlgmr.msra.gmra.mrb[2].mxu0 %vm261_vm3, %v483_v32 }
 0x1f9   : > { %1462 = vmatpush3.bf16.xpose.msk.msra.mxu0 %vm1635_vm2, %v1625_v4  ;;  %1380 = vmatprep.mubr.msk.f32.mxu0 %vm1562_vm0, %v1563_v6  ;;  %v1737_v4 = vld [vmem:[%s1852_s1] sm:$0xff]  }
 0x1fa   : > { %1463 = vmatprep.subr.bf16.mxu0 %v1561_v3  ;;  %v1742_v3 = vld [vmem:[%s1852_s1 + $0x8] sm:$0xff]   ;;  %1383 = vmatprep.subr.bf16.mxu1 %v1737_v4  ;;  %v633_v6 = vld [vmem:[%s1854_s3] sm:$0x1] }
 0x1fb   : > { %1384 = vmatpush3.bf16.msra.mxu1 %v1737_v4 }
 0x1fc   : > { %1385 = vmatprep.subr.bf16.mxu1 %v1742_v3 }
 0x1ff   : > { %1386 = vmatpush3.bf16.msra.mxu1 %v1742_v3 }
 0x201   : > { %1466 = vmatpush3.bf16.xpose.msk.msra.mxu0 %vm1635_vm2, %v1642_v8 }
 0x2cb   : > { %v553_v33 = vpop.f32.mrb[2].mxu0 }
 0x2cc   : > { %v557_v34 = vmul.f32 0.00390625, %v553_v33  ;;  %v1371_v35 = vpop.f32.mrb[3].mxu0 }
 0x2ce   : > { %v558_v36 = vadd.f32 1e-05, %v557_v34 }
 0x2d0   : > { %1503 = vrsqrt.f32 %v558_v36 }
 0x2da   : > { %v1504_v37 = vpop.eup %1503 }
 0x2db   : > { %1381 = vmatmul.mubr.msk.f32.vlgmr.msra.gmra.mrb[4].mxu0 %vm357_vm1, %v1504_v37 }
 0x3ae   : > { %v629_v7 = vpop.f32.mrb[4].mxu0 }
 0x3af   : > { %v635_v8 = vmul.f32 %v633_v6, %v629_v7  ;;  %v1382_v38 = vpop.f32.mrb[5].mxu0 }
 0x3b1   : > { %v639_v39 = vrot.slane %v635_v8, %v445_v43 }
 0x3b3   : > { %v640_v41 = vmul.f32 %v639_v39, %v447_v47  ;;  %v641_v44 = vmul.f32 %v639_v39, %v448_v48  ;;  %v642_v45 = vmul.f32 %v639_v39, %v449_v49  ;;  %v643_v46 = vmul.f32 %v639_v39, %v450_v50 }
 0x3b4   : > { %v644_v52 = vmul.f32 %v639_v39, %v451_v51  ;;  %v645_v53 = vmul.f32 %v639_v39, %v452_v55  ;;  %v646_v42 = vmul.f32 %v639_v39, %v453_v60  ;;  %v647_v43 = vmul.f32 %v639_v39, %v454_v0  ;;  %v1763_v51 = vld [vmem:[%s1853_s2] ss:$0 sm:$0xff] }
 0x3b5   : > { %v652_v54 = vadd.f32 %v1267_v40, %v640_v41  ;;  %v653_v56 = vadd.f32 %v1267_v40, %v641_v44  ;;  %v654_v57 = vadd.f32 %v1267_v40, %v642_v45  ;;  %v655_v58 = vadd.f32 %v1267_v40, %v643_v46 }
 0x3b6   : > { %v656_v59 = vadd.f32 %v1267_v40, %v644_v52  ;;  %v657_v61 = vadd.f32 %v1267_v40, %v645_v53  ;;  %v658_v47 = vadd.f32 %v1267_v40, %v646_v42  ;;  %v659_v48 = vadd.f32 %v1267_v40, %v647_v43 }
 0x3b7   : > { %v660_v62 = vpack.c.bf16 %v653_v56, %v652_v54  ;;  %v661_v63 = vpack.c.bf16 %v655_v58, %v654_v57 }
 0x3b8   : > { %v662_v1 = vpack.c.bf16 %v657_v61, %v656_v59  ;;  %v663_v49 = vpack.c.bf16 %v659_v48, %v658_v47 }
 0x3b9   : > { %1387 = vmatprep.mubr.msk.bf16.mxu1 %vm261_vm3, %v660_v62 }
 0x3ba   : > { %1388 = vmatmul.mubr.msk.bf16.vlgmr.msra.gmra.mrb[4].mxu1 %vm261_vm3, %v661_v63 }
 0x3bb   : > { %1391 = vmatprep.mubr.msk.bf16.mxu1 %vm261_vm3, %v662_v1 }
 0x3c2   : > { %1392 = vmatmul.mubr.msk.bf16.gmra.mrb[8].mxu1 %vm261_vm3, %v663_v49 }
 0x48d   : > { %v1389_v50 = vpop.f32.mrb[4].mxu1 }
 0x48e   : > { %v733_v55 = vpop.f32.mrb[5].mxu1  ;;  %v742_v0 = vadd.f32 %v1389_v50, %v1763_v51 }
 0x48f   : > { %v1390_v60 = vpop.f32.mrb[6].mxu1  ;;  %v734_v13 = vadd.f32 %v1763_v51, %v733_v55 }
 0x490   : > { %v745_v2 = vadd.f32 %v1390_v60, %v1763_v51  ;;  %v736_v5 = vpop.f32.mrb[7].mxu1 }
 0x491   : > { %v737_v14 = vadd.f32 %v1763_v51, %v736_v5 }
 0x492   : > { %v1769_v15 = vpack.c.bf16 %v745_v2, %v742_v0 }
 0x493   : > { %v764_v17 = vpack.c.bf16 %v737_v14, %v734_v13 }
 0x495   : > { %v1393_v18 = vpop.f32.mrb[8].mxu1  ;;  %772 = vrot.lane.b32.xlu0 %v764_v17, %s1564_s23  ;;  %1403 = vmatprep.mubr.msk.bf16.mxu1 %vm261_vm3, %v764_v17 }
 0x496   : > { %v749_v20 = vpop.f32.mrb[9].mxu1  ;;  %v758_v23 = vadd.f32 %v1393_v18, %v1763_v51 }
 0x497   : > { %v1394_v21 = vpop.f32.mrb[10].mxu1  ;;  %v750_v27 = vadd.f32 %v1763_v51, %v749_v20 }
 0x498   : > { %v761_v24 = vadd.f32 %v1394_v21, %v1763_v51  ;;  %v752_v26 = vpop.f32.mrb[11].mxu1 }
 0x499   : > { %v753_v28 = vadd.f32 %v1763_v51, %v752_v26  ;;  %774 = vrot.lane.b32.xlu0 %v1769_v15, %s1564_s23 }
 0x49a   : > { %v767_v29 = vpack.c.bf16 %v761_v24, %v758_v23 }
 0x49b   : > { %v766_v30 = vpack.c.bf16 %v753_v28, %v750_v27 }
 0x49d   : > { %776 = vrot.lane.b32.xlu1 %v766_v30, %s1564_s23 }
 0x4a1   : > { %778 = vrot.lane.b32.xlu1 %v767_v29, %s1564_s23 }
 0x4a5   : > { %962 = vrot.lane.b32.xlu1 %v764_v17, %s1565_s24 }
 0x507   : > { %v773_v31 = vpop.permute.xlu0 %772 }
 0x508   : > { %v793_v32 = vsel %vm261_vm3, %v773_v31, 0  ;;  %1467 = vmatprep.subr.msk.bf16.mxu1 %vm261_vm3, %v773_v31 }
 0x509   : > { %1396 = vmatpush3.bf16.xpose.msra.mxu1 %v793_v32 }
 0x50b   : > { %v775_v33 = vpop.permute.xlu0 %774 }
 0x50c   : > { %1468 = vmatprep.subr.msk.bf16.mxu1 %vm261_vm3, %v775_v33  ;;  %v796_v35 = vsel %vm261_vm3, %v775_v33, 0 }
 0x50f   : > { %v777_v34 = vpop.permute.xlu1 %776 }
 0x510   : > { %v799_v6 = vsel %vm261_vm3, %v777_v34, 0 }
 0x511   : > { %1398 = vmatpush3.bf16.xpose.msra.mxu1 %v796_v35 }
 0x512   : > { %1469 = vmatprep.subr.msk.bf16.mxu1 %vm261_vm3, %v777_v34 }
 0x513   : > { %v779_v36 = vpop.permute.xlu1 %778 }
 0x514   : > { %v802_v7 = vsel %vm261_vm3, %v779_v36, 0 }
 0x517   : > { %v963_v37 = vpop.permute.xlu1 %962 }
 0x518   : > { %1411 = vmatprep.subr.bf16.mxu0 %v963_v37 }
 0x519   : > { %1400 = vmatpush3.bf16.xpose.msra.mxu1 %v799_v6  ;;  %1412 = vmatpush3.bf16.msra.mxu0 %v963_v37 }
 0x51a   : > { %1470 = vmatprep.subr.msk.bf16.mxu1 %vm261_vm3, %v779_v36 }
 0x521   : > { %1402 = vmatpush3.bf16.xpose.msra.mxu1 %v802_v7 }
 0x528   : > { %1404 = vmatmul.mubr.msk.bf16.vlgmr.msra.gmra.mrb[12].mxu1 %vm261_vm3, %v1769_v15 }
 0x529   : > { %1407 = vmatprep.mubr.msk.bf16.mxu1 %vm261_vm3, %v766_v30 }
 0x530   : > { %1408 = vmatmul.mubr.msk.bf16.gmra.mrb[16].mxu1 %vm261_vm3, %v767_v29 }
 0x5fb   : > { %v1405_v8 = vpop.f32.mrb[12].mxu1 }
 0x5fc   : > { %v871_v38 = vmul.f32 0.17677669, %v1405_v8  ;;  %v838_v39 = vpop.f32.mrb[13].mxu1 }
 0x5fd   : > { %v1406_v40 = vpop.f32.mrb[14].mxu1  ;;  %v869_v41 = vmul.f32 0.17677669, %v838_v39 }
 0x5fe   : > { %v841_v44 = vpop.f32.mrb[15].mxu1  ;;  %v884_v45 = vsel %vm877_vm4, %v871_v38, -inf  ;;  %v872_v52 = vmul.f32 0.17677669, %v1406_v40 }
 0x5ff   : > { %v870_v46 = vmul.f32 0.17677669, %v841_v44  ;;  %885 = vmax.xlane.f32.xlu0 %v884_v45  ;;  %v878_v54 = vsel %vm877_vm4, %v869_v41, -inf }
 0x600   : > { %v887_v61 = vsel %vm877_vm4, %v872_v52, -inf }
 0x601   : > { %v881_v53 = vsel %vm877_vm4, %v870_v46, -inf }
 0x602   : > { %882 = vmax.xlane.f32.xlu1 %v881_v53 }
 0x603   : > { %879 = vmax.xlane.f32.xlu0 %v878_v54  ;;  %v1409_v56 = vpop.f32.mrb[16].mxu1 }
 0x604   : > { %v875_v57 = vmul.f32 0.17677669, %v1409_v56  ;;  %v854_v58 = vpop.f32.mrb[17].mxu1 }
 0x605   : > { %v1410_v59 = vpop.f32.mrb[18].mxu1  ;;  %v873_v62 = vmul.f32 0.17677669, %v854_v58 }
 0x606   : > { %v876_v63 = vmul.f32 0.17677669, %v1410_v59  ;;  %v857_v42 = vpop.f32.mrb[19].mxu1  ;;  %v896_v43 = vsel %vm877_vm4, %v875_v57, -inf }
 0x607   : > { %888 = vmax.xlane.f32.xlu0 %v887_v61  ;;  %897 = vmax.xlane.f32.xlu1 %v896_v43  ;;  %v874_v1 = vmul.f32 0.17677669, %v857_v42  ;;  %v890_v47 = vsel %vm877_vm4, %v873_v62, -inf }
 0x608   : > { %v899_v48 = vsel %vm877_vm4, %v876_v63, -inf }
 0x609   : > { %v893_v49 = vsel %vm877_vm4, %v874_v1, -inf }
 0x60b   : > { %891 = vmax.xlane.f32.xlu1 %v890_v47  ;;  %900 = vmax.xlane.f32.xlu0 %v899_v48 }
 0x60f   : > { %894 = vmax.xlane.f32.xlu0 %v893_v49 }
 0x61c   : > { %966 = vrot.lane.b32.xlu1 %v766_v30, %s1565_s24 }
 0x620   : > { %968 = vrot.lane.b32.xlu1 %v767_v29, %s1565_s24 }
 0x625   : > { %964 = vrot.lane.b32.xlu0 %v1769_v15, %s1565_s24 }
 0x68c   : > { %v886_v50 = vpop.xlane.xlu0 %885 }
 0x68d   : > { %v904_v55 = vsub.f32 %v871_v38, %v886_v50 }
 0x68f   : > { %v914_v60 = vmul.f32 1.442695, %v904_v55  ;;  %v883_v0 = vpop.xlane.xlu1 %882 }
 0x690   : > { %v903_v2 = vsub.f32 %v870_v46, %v883_v0  ;;  %v880_v5 = vpop.xlane.xlu0 %879 }
 0x691   : > { %1505 = vpow2.f32 %v914_v60  ;;  %v902_v13 = vsub.f32 %v869_v41, %v880_v5 }
 0x692   : > { %v912_v14 = vmul.f32 1.442695, %v903_v2 }
 0x693   : > { %v910_v17 = vmul.f32 1.442695, %v902_v13 }
 0x694   : > { %1507 = vpow2.f32 %v912_v14  ;;  %v889_v18 = vpop.xlane.xlu0 %888  ;;  %v898_v20 = vpop.xlane.xlu1 %897 }
 0x695   : > { %1509 = vpow2.f32 %v910_v17  ;;  %v905_v21 = vsub.f32 %v872_v52, %v889_v18  ;;  %v908_v23 = vsub.f32 %v875_v57, %v898_v20 }
 0x697   : > { %v916_v24 = vmul.f32 1.442695, %v905_v21  ;;  %v922_v26 = vmul.f32 1.442695, %v908_v23 }
 0x698   : > { %v892_v27 = vpop.xlane.xlu1 %891  ;;  %v901_v15 = vpop.xlane.xlu0 %900 }
 0x699   : > { %1511 = vpow2.f32 %v916_v24  ;;  %v906_v28 = vsub.f32 %v873_v62, %v892_v27  ;;  %v909_v29 = vsub.f32 %v876_v63, %v901_v15 }
 0x69a   : > { %1513 = vpow2.f32 %v922_v26 }
 0x69b   : > { %v1506_v30 = vpop.eup %1505  ;;  %v918_v31 = vmul.f32 1.442695, %v906_v28  ;;  %v924_v32 = vmul.f32 1.442695, %v909_v29 }
 0x69c   : > { %v895_v33 = vpop.xlane.xlu0 %894  ;;  %v932_v34 = vsel %vm877_vm4, %v1506_v30, 0.0  ;;  %v967_v8 = vpop.permute.xlu1 %966 }
 0x69d   : > { %1515 = vpow2.f32 %v918_v31  ;;  %v907_v35 = vsub.f32 %v874_v1, %v895_v33  ;;  %933 = vadd.xlane.f32.xlu0 %v932_v34 }
 0x69e   : > { %v1508_v36 = vpop.eup %1507  ;;  %1517 = vpow2.f32 %v924_v32 }
 0x69f   : > { %v1510_v37 = vpop.eup %1509  ;;  %v920_v6 = vmul.f32 1.442695, %v907_v35  ;;  %v929_v7 = vsel %vm877_vm4, %v1508_v36, 0.0 }
 0x6a0   : > { %930 = vadd.xlane.f32.xlu1 %v929_v7  ;;  %v965_v38 = vpop.permute.xlu0 %964  ;;  %v926_v39 = vsel %vm877_vm4, %v1510_v37, 0.0  ;;  %v958_v40 = vpack.c.bf16 %v1508_v36, %v1510_v37  ;;  %v969_v52 = vpop.permute.xlu1 %968 }
 0x6a1   : > { %1519 = vpow2.f32 %v920_v6  ;;  %927 = vadd.xlane.f32.xlu0 %v926_v39  ;;  %1413 = vmatprep.subr.bf16.mxu0 %v965_v38 }
 0x6a2   : > { %1414 = vmatpush3.bf16.msra.mxu0 %v965_v38  ;;  %1419 = vmatprep.mubr.msk.bf16.mxu0 %vm877_vm4, %v958_v40 }
 0x6a3   : > { %v1512_v41 = vpop.eup %1511  ;;  %1415 = vmatprep.subr.bf16.mxu0 %v967_v8 }
 0x6a4   : > { %v1514_v44 = vpop.eup %1513  ;;  %v935_v45 = vsel %vm877_vm4, %v1512_v41, 0.0  ;;  %v959_v61 = vpack.c.bf16 %v1512_v41, %v1506_v30 }
 0x6a5   : > { %v944_v46 = vsel %vm877_vm4, %v1514_v44, 0.0  ;;  %936 = vadd.xlane.f32.xlu0 %v935_v45 }
 0x6a6   : > { %945 = vadd.xlane.f32.xlu1 %v944_v46  ;;  %1416 = vmatpush3.bf16.msra.mxu0 %v967_v8 }
 0x6a7   : > { %v1516_v53 = vpop.eup %1515  ;;  %1417 = vmatprep.subr.bf16.mxu0 %v969_v52 }
 0x6a8   : > { %v1518_v54 = vpop.eup %1517  ;;  %v938_v56 = vsel %vm877_vm4, %v1516_v53, 0.0 }
 0x6a9   : > { %v947_v57 = vsel %vm877_vm4, %v1518_v54, 0.0  ;;  %v961_v63 = vpack.c.bf16 %v1518_v54, %v1514_v44 }
 0x6aa   : > { %939 = vadd.xlane.f32.xlu1 %v938_v56  ;;  %948 = vadd.xlane.f32.xlu0 %v947_v57 }
 0x6ab   : > { %v1520_v58 = vpop.eup %1519  ;;  %1418 = vmatpush3.bf16.msra.mxu0 %v969_v52 }
 0x6ac   : > { %v941_v59 = vsel %vm877_vm4, %v1520_v58, 0.0  ;;  %v960_v62 = vpack.c.bf16 %v1520_v58, %v1516_v53 }
 0x6ae   : > { %942 = vadd.xlane.f32.xlu0 %v941_v59  ;;  %1420 = vmatmul.mubr.msk.bf16.vlgmr.msra.gmra.mrb[8].mxu0 %vm877_vm4, %v959_v61 }
 0x6af   : > { %1423 = vmatprep.mubr.msk.bf16.mxu0 %vm877_vm4, %v960_v62 }
 0x6b6   : > { %1424 = vmatmul.mubr.msk.bf16.gmra.mrb[12].mxu0 %vm877_vm4, %v961_v63 }
 0x6bb   : > { %1063 = vrot.lane.b32.xlu1 %v1737_v4, %s1566_s25 }
 0x6bf   : > { %1069 = vrot.lane.b32.xlu1 %v1763_v51, %s1566_s25 }
 0x6c4   : > { %1065 = vrot.lane.b32.xlu0 %v1742_v3, %s1566_s25 }
 0x72a   : > { %v934_v42 = vpop.xlane.xlu0 %933 }
 0x72b   : > { %1521 = vrcp.f32 %v934_v42 }
 0x72d   : > { %v931_v43 = vpop.xlane.xlu1 %930 }
 0x72e   : > { %v928_v1 = vpop.xlane.xlu0 %927 }
 0x72f   : > { %1523 = vrcp.f32 %v928_v1 }
 0x732   : > { %v937_v47 = vpop.xlane.xlu0 %936 }
 0x733   : > { %v946_v48 = vpop.xlane.xlu1 %945  ;;  %1525 = vrcp.f32 %v937_v47 }
 0x734   : > { %1527 = vrcp.f32 %v931_v43 }
 0x735   : > { %1529 = vrcp.f32 %v946_v48  ;;  %v1522_v4 = vpop.eup %1521 }
 0x737   : > { %v940_v49 = vpop.xlane.xlu1 %939  ;;  %v949_v50 = vpop.xlane.xlu0 %948 }
 0x738   : > { %1531 = vrcp.f32 %v940_v49 }
 0x739   : > { %1533 = vrcp.f32 %v949_v50  ;;  %v1524_v51 = vpop.eup %1523 }
 0x73b   : > { %v943_v55 = vpop.xlane.xlu0 %942  ;;  %v1064_v60 = vpop.permute.xlu1 %1063 }
 0x73c   : > { %1427 = vmatprep.subr.bf16.mxu0 %v1064_v60  ;;  %1535 = vrcp.f32 %v943_v55 }
 0x73d   : > { %1428 = vmatpush3.bf16.msra.mxu0 %v1064_v60  ;;  %v1526_v13 = vpop.eup %1525 }
 0x73e   : > { %v1528_v18 = vpop.eup %1527 }
 0x73f   : > { %v1066_v0 = vpop.permute.xlu0 %1065  ;;  %v1530_v27 = vpop.eup %1529 }
 0x740   : > { %1429 = vmatprep.subr.bf16.mxu0 %v1066_v0  ;;  %v1070_v8 = vpop.permute.xlu1 %1069 }
 0x741   : > { %1430 = vmatpush3.bf16.msra.mxu0 %v1066_v0 }
 0x742   : > { %v1532_v28 = vpop.eup %1531 }
 0x743   : > { %v1534_v31 = vpop.eup %1533 }
 0x746   : > { %v1536_v34 = vpop.eup %1535 }
 0x781   : > { %v1421_v3 = vpop.f32.mrb[8].mxu0 }
 0x782   : > { %v1053_v2 = vmul.f32 %v1522_v4, %v1421_v3  ;;  %v1020_v5 = vpop.f32.mrb[9].mxu0 }
 0x783   : > { %v1051_v14 = vmul.f32 %v1524_v51, %v1020_v5  ;;  %v1422_v17 = vpop.f32.mrb[10].mxu0 }
 0x784   : > { %v1054_v20 = vmul.f32 %v1526_v13, %v1422_v17  ;;  %v1023_v21 = vpop.f32.mrb[11].mxu0 }
 0x785   : > { %v1052_v23 = vmul.f32 %v1528_v18, %v1023_v21 }
 0x786   : > { %v1060_v24 = vpack.c.bf16 %v1054_v20, %v1053_v2 }
 0x787   : > { %v1059_v26 = vpack.c.bf16 %v1052_v23, %v1051_v14 }
 0x789   : > { %v1425_v15 = vpop.f32.mrb[12].mxu0  ;;  %1431 = vmatprep.mubr.msk.bf16.mxu0 %vm261_vm3, %v1059_v26 }
 0x78a   : > { %v1057_v29 = vmul.f32 %v1530_v27, %v1425_v15  ;;  %v1036_v30 = vpop.f32.mrb[13].mxu0  ;;  %1432 = vmatmul.mubr.msk.bf16.vlgmr.msra.gmra.mrb[16].mxu0 %vm261_vm3, %v1060_v24 }
 0x78b   : > { %v1055_v32 = vmul.f32 %v1532_v28, %v1036_v30  ;;  %v1426_v33 = vpop.f32.mrb[14].mxu0 }
 0x78c   : > { %v1058_v35 = vmul.f32 %v1534_v31, %v1426_v33  ;;  %v1039_v36 = vpop.f32.mrb[15].mxu0 }
 0x78d   : > { %v1056_v37 = vmul.f32 %v1536_v34, %v1039_v36 }
 0x78e   : > { %v1062_v6 = vpack.c.bf16 %v1058_v35, %v1057_v29 }
 0x78f   : > { %v1061_v7 = vpack.c.bf16 %v1056_v37, %v1055_v32 }
 0x791   : > { %1435 = vmatprep.mubr.msk.bf16.mxu0 %vm261_vm3, %v1061_v7 }
 0x792   : > { %1436 = vmatmul.mubr.msk.bf16.gmra.mrb[20].mxu0 %vm261_vm3, %v1062_v6 }
 0x85d   : > { %v1433_v38 = vpop.f32.mrb[16].mxu0 }
 0x85e   : > { %v1127_v39 = vadd.f32 %v1433_v38, %v1070_v8  ;;  %v1118_v40 = vpop.f32.mrb[17].mxu0 }
 0x85f   : > { %v1119_v41 = vadd.f32 %v1118_v40, %v1070_v8  ;;  %v1434_v44 = vpop.f32.mrb[18].mxu0 }
 0x860   : > { %v1151_v45 = vadd.f32 %v1127_v39, %v1662_v11  ;;  %v1130_v46 = vadd.f32 %v1434_v44, %v1070_v8  ;;  %v1121_v52 = vpop.f32.mrb[19].mxu0 }
 0x861   : > { %v1149_v53 = vadd.f32 %v1119_v41, %v1658_v9  ;;  %v1122_v54 = vadd.f32 %v1121_v52, %v1070_v8 }
 0x862   : > { %1159 = vst.msk [vmem:[%s246_s28 + $0x10] sm:$0xff] %vm261_vm3, %v1151_v45  ;;  %v1152_v56 = vadd.f32 %v1130_v46, %v1664_v12 }
 0x863   : > { %1157 = vst.msk [vmem:[%s246_s28] sm:$0xff] %vm261_vm3, %v1149_v53  ;;  %v1150_v57 = vadd.f32 %v1122_v54, %v1660_v10 }
 0x864   : > { %1160 = vst.msk [vmem:[%s246_s28 + $0x18] sm:$0xff] %vm261_vm3, %v1152_v56 }
 0x865   : > { %1158 = vst.msk [vmem:[%s246_s28 + $0x8] sm:$0xff] %vm261_vm3, %v1150_v57  ;;  %v1437_v58 = vpop.f32.mrb[20].mxu0 }
 0x866   : > { %v1143_v59 = vadd.f32 %v1437_v58, %v1070_v8  ;;  %v1134_v11 = vpop.f32.mrb[21].mxu0 }
 0x867   : > { %v1135_v61 = vadd.f32 %v1134_v11, %v1070_v8  ;;  %v1438_v62 = vpop.f32.mrb[22].mxu0 }
 0x868   : > { %v1155_v9 = vadd.f32 %v1143_v59, %v1684_v22  ;;  %v1146_v63 = vadd.f32 %v1438_v62, %v1070_v8  ;;  %v1137_v42 = vpop.f32.mrb[23].mxu0 }
 0x869   : > { %v1153_v43 = vadd.f32 %v1135_v61, %v1673_v16  ;;  %v1138_v12 = vadd.f32 %v1137_v42, %v1070_v8 }
 0x86a   : > { %1163 = vst.msk [vmem:[%s246_s28 + $0x30] sm:$0xff] %vm261_vm3, %v1155_v9  ;;  %v1156_v10 = vadd.f32 %v1146_v63, %v1688_v25 }
 0x86b   : > { %1161 = vst.msk [vmem:[%s246_s28 + $0x20] sm:$0xff] %vm261_vm3, %v1153_v43  ;;  %v1154_v1 = vadd.f32 %v1138_v12, %v1677_v19 }
 0x86c   : > { %1164 = vst.msk [vmem:[%s246_s28 + $0x38] sm:$0xff] %vm261_vm3, %v1156_v10 }
 0x86d   : > { %1162 = vst.msk [vmem:[%s246_s28 + $0x28] sm:$0xff] %vm261_vm3, %v1154_v1 }
 0x86e PF: > { %s15_s20 = sadd.s32 1, %s1559_s20   ;;  %s1859_s18 = smov %s1555_s19 }
 0x86f   : > { %p12_p5 = scmp.ge.s32.totalorder %s15_s20, 4   ;;  %s1860_s19 = smov %s1862_s21 }
 0x871   :  { %14 = sbr.rel (!%p12_p5) target bundleno = 2 (0x2), region = 70 }

</bundles_post_ra>
